<compile_context>
chip_gen: v7x
topology: tpu7x:2x2x1
jax: 0.10.0
libtpu: 0.0.40
codegen_flags: <defaults>
</compile_context>

<pallas_src>
import math

import jax
import jax.numpy as jnp
from jax.experimental import pallas as pl
from jax.experimental.pallas import tpu as pltpu


def attention_kernel(hidden_ref, enc_ref, w_h_ref, w_e_ref, b_ref, v_ref, out_ref):
    """Fused additive attention.

    hidden_ref : (B, Hd)    decoder hidden state
    enc_ref    : (B, S, E)  encoder outputs
    w_h_ref    : (Hd, Hd)   attn-weight columns acting on `hidden` (pre-transposed)
    w_e_ref    : (E, Hd)    attn-weight columns acting on encoder outputs (pre-transposed)
    b_ref      : (1, Hd)    attn bias
    v_ref      : (1, Hd)    v weight row (Linear(dec_hid, 1, bias=False))
    out_ref    : (B, E)     context vector
    """
    B, S, E = enc_ref.shape
    Hd = w_h_ref.shape[1]

    # `hidden` is repeated over all S source positions in the reference module ->
    # project it once and broadcast, never materializing the repeat/concat.
    hid_proj = (jnp.dot(hidden_ref[...], w_h_ref[...],
                        preferred_element_type=jnp.float32)
                + b_ref[...])                                        # (B, Hd)

    enc = enc_ref[...]                                               # (B, S, E)

    # One large MXU matmul over all B*S encoder rows.
    enc_proj = jnp.dot(enc.reshape(B * S, E), w_e_ref[...],
                       preferred_element_type=jnp.float32).reshape(B, S, Hd)

    energy = jnp.tanh(enc_proj + hid_proj[:, None, :])               # (B, S, Hd)  (EUP tanh)

    # scores = energy @ v^T : VPU multiply + lane (XLU) reduce; avoids an N=1 MXU matmul.
    scores = jnp.sum(energy * v_ref[...][None, :, :], axis=-1)       # (B, S)

    # Numerically stable softmax over source positions (denominator via EUP reciprocal).
    m = jnp.max(scores, axis=-1, keepdims=True)                      # (B, 1)
    p = jnp.exp(scores - m)                                          # (B, S)
    w = p * pl.reciprocal(jnp.sum(p, axis=-1, keepdims=True))        # (B, S)

    # Weighted sum of encoder outputs: broadcast-multiply + sublane reduce over S.
    out_ref[...] = jnp.sum(enc * w[:, :, None], axis=1)              # (B, E)


def attention_forward(hidden, encoder_outputs, params):
    """Wrapper: split the concat-Linear weight once (host side) and run one fused call."""
    B, S, E = encoder_outputs.shape
    Hd = params["w_attn"].shape[0]            # nn.Linear(E+Hd, Hd) -> weight (Hd, E+Hd)

    # torch.cat((hidden, encoder_outputs), dim=2): the first Hd input columns of W_attn
    # act on `hidden`, the remaining E act on `encoder_outputs`.
    w_h = jnp.asarray(params["w_attn"][:, :Hd].T, jnp.float32)       # (Hd, Hd)
    w_e = jnp.asarray(params["w_attn"][:, Hd:].T, jnp.float32)       # (E, Hd)
    b = jnp.asarray(params["b_attn"].reshape(1, Hd), jnp.float32)    # (1, Hd)
    v = jnp.asarray(params["w_v"].reshape(1, Hd), jnp.float32)       # (1, Hd)

    flops = (2 * B * Hd * Hd            # hidden projection
             + 2 * B * S * E * Hd       # encoder projection
             + 4 * B * S * Hd           # add + v-dot (mul + reduce)
             + 3 * B * S * E)           # weighted sum
    bytes_accessed = 4 * (B * Hd + B * S * E + Hd * Hd + E * Hd + 2 * Hd + B * E)

    vmem = pl.BlockSpec(memory_space=pltpu.MemorySpace.VMEM)
    return pl.pallas_call(
        attention_kernel,
        out_shape=jax.ShapeDtypeStruct((B, E), jnp.float32),
        in_specs=[vmem] * 6,
        out_specs=vmem,
        cost_estimate=pl.CostEstimate(flops=flops,
                                      transcendentals=B * S * (Hd + 1),
                                      bytes_accessed=bytes_accessed),
    )(hidden.astype(jnp.float32), encoder_outputs.astype(jnp.float32),
      w_h, w_e, b, v)


def _reference_forward(hidden, encoder_outputs, params):
    """Pure-JAX mirror of the PyTorch forward (repeat + concat + tanh + v + softmax + sum)."""
    B, S, E = encoder_outputs.shape
    Hd = params["w_attn"].shape[0]
    hid_rep = jnp.broadcast_to(hidden[:, None, :], (B, S, Hd))
    cat = jnp.concatenate([hid_rep, encoder_outputs], axis=2)        # (B, S, Hd+E)
    energy = jnp.tanh(cat @ params["w_attn"].T + params["b_attn"])   # (B, S, Hd)
    attention = (energy @ params["w_v"].T)[..., 0]                   # (B, S)
    w = jax.nn.softmax(attention, axis=1)[..., None]                 # (B, S, 1)
    return jnp.sum(encoder_outputs * w, axis=1)                      # (B, E)


if __name__ == "__main__":
    # Small shapes consistent with the module's forward.
    B, S = 2, 8
    enc_hid_dim = 32
    dec_hid_dim = 32

    key = jax.random.PRNGKey(0)
    ks = jax.random.split(key, 6)

    hidden = jax.random.normal(ks[0], (B, dec_hid_dim), jnp.float32)
    encoder_outputs = jax.random.normal(ks[1], (B, S, enc_hid_dim), jnp.float32)

    # Deterministic parameter init matching PyTorch nn.Linear U(-1/sqrt(fan_in), 1/sqrt(fan_in)).
    k_attn = 1.0 / math.sqrt(enc_hid_dim + dec_hid_dim)
    k_v = 1.0 / math.sqrt(dec_hid_dim)
    params = {
        "w_attn": jax.random.uniform(ks[2], (dec_hid_dim, enc_hid_dim + dec_hid_dim),
                                     jnp.float32, -k_attn, k_attn),
        "b_attn": jax.random.uniform(ks[3], (dec_hid_dim,), jnp.float32, -k_attn, k_attn),
        "w_v": jax.random.uniform(ks[4], (1, dec_hid_dim), jnp.float32, -k_v, k_v),
    }

    context = attention_forward(hidden, encoder_outputs, params)
    jax.block_until_ready(context)

    ref = _reference_forward(hidden, encoder_outputs, params)
    assert context.shape == (B, enc_hid_dim)
    assert jnp.allclose(context, ref, rtol=1e-3, atol=1e-3)

    print("KERNEL_OK")
</pallas_src>

<mosaic_0001>
module attributes {stable_mosaic.version = 11 : i64} {
  func.func @attention_kernel(%arg0: memref<2x32xf32, #tpu.memory_space<vmem>>, %arg1: memref<2x8x32xf32, #tpu.memory_space<vmem>>, %arg2: memref<32x32xf32, #tpu.memory_space<vmem>>, %arg3: memref<32x32xf32, #tpu.memory_space<vmem>>, %arg4: memref<1x32xf32, #tpu.memory_space<vmem>>, %arg5: memref<1x32xf32, #tpu.memory_space<vmem>>, %arg6: memref<2x32xf32, #tpu.memory_space<vmem>>) attributes {dimension_semantics = [], scalar_prefetch = 0 : i64, scratch_operands = 0 : i64, tpu.core_type = #tpu.core_type<tc>} {
    %c0 = arith.constant 0 : index
    %c0_0 = arith.constant 0 : index
    %0 = vector.load %arg0[%c0, %c0_0] : memref<2x32xf32, #tpu.memory_space<vmem>>, vector<2x32xf32>
    %c0_1 = arith.constant 0 : index
    %c0_2 = arith.constant 0 : index
    %1 = vector.load %arg2[%c0_1, %c0_2] : memref<32x32xf32, #tpu.memory_space<vmem>>, vector<32x32xf32>
    %cst = arith.constant dense<0.000000e+00> : vector<2x32xf32>
    %2 = tpu.matmul %0, %1, %cst {dimension_numbers = #tpu.dot_dimension_numbers<[1], [0], [0], [1], [0, 0, 1, 1], [], []>} : vector<2x32xf32>, vector<32x32xf32>, vector<2x32xf32> -> vector<2x32xf32>
    %c0_3 = arith.constant 0 : index
    %c0_4 = arith.constant 0 : index
    %3 = vector.load %arg4[%c0_3, %c0_4] : memref<1x32xf32, #tpu.memory_space<vmem>>, vector<1x32xf32>
    %4 = vector.broadcast %3 : vector<1x32xf32> to vector<2x32xf32>
    %5 = arith.addf %2, %4 : vector<2x32xf32>
    %c0_5 = arith.constant 0 : index
    %c0_6 = arith.constant 0 : index
    %c0_7 = arith.constant 0 : index
    %6 = vector.load %arg1[%c0_5, %c0_6, %c0_7] : memref<2x8x32xf32, #tpu.memory_space<vmem>>, vector<2x8x32xf32>
    %7 = vector.shape_cast %6 : vector<2x8x32xf32> to vector<16x32xf32>
    %c0_8 = arith.constant 0 : index
    %c0_9 = arith.constant 0 : index
    %8 = vector.load %arg3[%c0_8, %c0_9] : memref<32x32xf32, #tpu.memory_space<vmem>>, vector<32x32xf32>
    %cst_10 = arith.constant dense<0.000000e+00> : vector<16x32xf32>
    %9 = tpu.matmul %7, %8, %cst_10 {dimension_numbers = #tpu.dot_dimension_numbers<[1], [0], [0], [1], [0, 0, 1, 1], [], []>} : vector<16x32xf32>, vector<32x32xf32>, vector<16x32xf32> -> vector<16x32xf32>
    %10 = vector.shape_cast %9 : vector<16x32xf32> to vector<2x8x32xf32>
    %11 = vector.shape_cast %5 : vector<2x32xf32> to vector<2x1x32xf32>
    %12 = vector.broadcast %11 : vector<2x1x32xf32> to vector<2x8x32xf32>
    %13 = arith.addf %10, %12 : vector<2x8x32xf32>
    %14 = math.tanh %13 : vector<2x8x32xf32>
    %c0_11 = arith.constant 0 : index
    %c0_12 = arith.constant 0 : index
    %15 = vector.load %arg5[%c0_11, %c0_12] : memref<1x32xf32, #tpu.memory_space<vmem>>, vector<1x32xf32>
    %16 = vector.shape_cast %15 : vector<1x32xf32> to vector<1x1x32xf32>
    %17 = vector.broadcast %16 : vector<1x1x32xf32> to vector<2x8x32xf32>
    %18 = arith.mulf %14, %17 : vector<2x8x32xf32>
    %cst_13 = arith.constant dense<0.000000e+00> : vector<2x8xf32>
    %19 = vector.multi_reduction <add>, %18, %cst_13 [2] : vector<2x8x32xf32> to vector<2x8xf32>
    %cst_14 = arith.constant dense<0xFF800000> : vector<2xf32>
    %20 = vector.multi_reduction <maximumf>, %19, %cst_14 [1] : vector<2x8xf32> to vector<2xf32>
    %21 = vector.shape_cast %20 : vector<2xf32> to vector<2x1xf32>
    %22 = vector.broadcast %21 : vector<2x1xf32> to vector<2x8xf32>
    %23 = arith.subf %19, %22 : vector<2x8xf32>
    %24 = math.exp %23 : vector<2x8xf32>
    %cst_15 = arith.constant dense<0.000000e+00> : vector<2xf32>
    %25 = vector.multi_reduction <add>, %24, %cst_15 [1] : vector<2x8xf32> to vector<2xf32>
    %26 = vector.shape_cast %25 : vector<2xf32> to vector<2x1xf32>
    %27 = tpu.reciprocal %26 : vector<2x1xf32> -> vector<2x1xf32>
    %28 = vector.broadcast %27 : vector<2x1xf32> to vector<2x8xf32>
    %29 = arith.mulf %24, %28 : vector<2x8xf32>
    %30 = vector.shape_cast %29 : vector<2x8xf32> to vector<2x8x1xf32>
    %31 = vector.broadcast %30 : vector<2x8x1xf32> to vector<2x8x32xf32>
    %32 = arith.mulf %6, %31 : vector<2x8x32xf32>
    %cst_16 = arith.constant dense<0.000000e+00> : vector<2x32xf32>
    %33 = vector.multi_reduction <add>, %32, %cst_16 [1] : vector<2x8x32xf32> to vector<2x32xf32>
    %c0_17 = arith.constant 0 : index
    %c0_18 = arith.constant 0 : index
    %34 = vector.load %arg6[%c0_17, %c0_18] : memref<2x32xf32, #tpu.memory_space<vmem>>, vector<2x32xf32>
    tpu.vector_store %arg6[%c0_17, %c0_18], %33 {strides = array<i32>} : memref<2x32xf32, #tpu.memory_space<vmem>>, vector<2x32xf32>,
    return
  }
}

</mosaic_0001>

<bundles_post_ra>
// kernel: tpu_custom_call.1
= control target key start
LH: loop header
LB: loop body
LE: loop exit
PB: predicated region body
PF: predicated region fallthrough
CT: control target
= control target key end

     0   :  { %11 = vsyncpa [#allocation3], 0  ;;  %s764_s0 = inlined_call_operand.hbm [shape: f32[2,32], index: 0, kind: input, shape index: {}]   ;;  %s765_s1 = inlined_call_operand.hbm [shape: f32[2,8,32], index: 1, kind: input, shape index: {}]   ;;  %s766_s2 = inlined_call_operand.hbm [shape: f32[32,32], index: 2, kind: input, shape index: {}]   ;;  %s767_s3 = inlined_call_operand.hbm [shape: f32[32,32], index: 3, kind: input, shape index: {}]   ;;  %s768_s4 = inlined_call_operand.vmem [shape: f32[1,32], index: 4, kind: input, shape index: {}]   ;;  %s769_s5 = inlined_call_operand.vmem [shape: f32[1,32], index: 5, kind: input, shape index: {}]   ;;  %s770_s6 = inlined_call_operand.hbm [shape: f32[2,32], index: 6, kind: output, shape index: {}]  }
   0x1   :  { %12 = vsyncpa [#allocation6], 0 }
   0x2   :  { %13 = vsyncpa [#allocation9], 0 }
   0x3   :  { %14 = vsyncpa [#allocation4], 0  ;;  %s616_s21 = smov [#allocation5]   ;;  %s498_s25 = scalar_lea.hbm %s765_s1, 256 }
   0x4   :  { %s30_s22 = sshll.u32 %s616_s21, 4  ;;  %p499_p0 = scmp.ne.s32.totalorder %s765_s1, %s498_s25  ;;  %s31_s22 = int_to_ptr.vmem [resolvable:$true] %s30_s22 }
   0x5   :  { %p502_p1 = scmp.lt.u32.totalorder %s498_s25, %s765_s1 }
   0x7   :  { %p504_p2 = pnand %p502_p1, %p499_p0 }
   0x9   :  { %507 = shalt.err (!%p504_p2)
}
   0xa   :  { %s508_s30 = scalar_lea.vmem %s31_s22, 256  ;;  %p513_p4 = scmp.lt.s32.totalorder %s31_s22, %s31_s22 }
   0xb   :  { %p509_p3 = scmp.ne.s32.totalorder %s31_s22, %s508_s30  ;;  %p514_p5 = scmp.lt.s32.totalorder %s508_s30, %s508_s30 }
   0xd   :  { %p515_p6 = por %p514_p5, %p513_p4 }
   0xf   :  { %p516_p7 = pnand %p515_p6, %p509_p3 }
  0x11   :  { %519 = shalt.err (!%p516_p7)
}
  0x12   :  { %s617_s7 = smov 128   ;;  %s618_s8 = smov 8  }
  0x13   :  { %36 = dma.hbm_to_vmem [thread:$0]  %s765_s1, 256, %s31_s22, [#allocation6], %s617_s7, %s617_s7, %s618_s8  }
  0x14   :  { %s619_s11 = smov [#allocation2]   ;;  %s620_s13 = smov [#allocation7]  }
  0x15   :  { %s21_s12 = sshll.u32 %s619_s11, 4  ;;  %s42_s14 = sshll.u32 %s620_s13, 4  ;;  %s22_s12 = int_to_ptr.vmem [resolvable:$true] %s21_s12  ;;  %s43_s14 = int_to_ptr.vmem [resolvable:$true] %s42_s14 }
  0x16   :  { %s520_s17 = scalar_lea.hbm %s764_s0, 32 }
  0x17   :  { %p521_p8 = scmp.ne.s32.totalorder %s764_s0, %s520_s17  ;;  %p524_p9 = scmp.lt.u32.totalorder %s520_s17, %s764_s0 }
  0x19   :  { %p526_p10 = pnand %p524_p9, %p521_p8 }
  0x1b   :  { %529 = shalt.err (!%p526_p10)
}
  0x1c   :  { %s530_s1 = scalar_lea.vmem %s22_s12, 32  ;;  %p535_p12 = scmp.lt.s32.totalorder %s22_s12, %s22_s12 }
  0x1d   :  { %p531_p11 = scmp.ne.s32.totalorder %s22_s12, %s530_s1  ;;  %p536_p13 = scmp.lt.s32.totalorder %s530_s1, %s530_s1 }
  0x1f   :  { %p537_p0 = por %p536_p13, %p535_p12 }
  0x21   :  { %p538_p1 = pnand %p537_p0, %p531_p11 }
  0x23   :  { %541 = shalt.err (!%p538_p1)
}
  0x24   :  { %24 = dma.hbm_to_vmem [thread:$0]  %s764_s0, 32, %s22_s12, [#allocation3]  }
  0x25   :  { %s542_s26 = scalar_lea.hbm %s766_s2, 512 }
  0x26   :  { %p543_p2 = scmp.ne.s32.totalorder %s766_s2, %s542_s26  ;;  %p546_p3 = scmp.lt.u32.totalorder %s542_s26, %s766_s2 }
  0x28   :  { %p548_p4 = pnand %p546_p3, %p543_p2 }
  0x2a   :  { %551 = shalt.err (!%p548_p4)
}
  0x2b   :  { %s552_s9 = scalar_lea.vmem %s43_s14, 512  ;;  %p557_p6 = scmp.lt.s32.totalorder %s43_s14, %s43_s14 }
  0x2c   :  { %p553_p5 = scmp.ne.s32.totalorder %s43_s14, %s552_s9  ;;  %p558_p7 = scmp.lt.s32.totalorder %s552_s9, %s552_s9 }
  0x2e   :  { %p559_p8 = por %p558_p7, %p557_p6 }
  0x30   :  { %p560_p9 = pnand %p559_p8, %p553_p5 }
  0x32   :  { %563 = shalt.err (!%p560_p9)
}
  0x33   :  { %48 = dma.hbm_to_vmem [thread:$0]  %s766_s2, 512, %s43_s14, [#allocation6], %s617_s7, %s617_s7, %s618_s8  }
  0x34   :  { %s621_s11 = smov [#allocation8]   ;;  %s564_s16 = scalar_lea.hbm %s767_s3, 512 }
  0x35   :  { %s54_s12 = sshll.u32 %s621_s11, 4  ;;  %p565_p10 = scmp.ne.s32.totalorder %s767_s3, %s564_s16  ;;  %s55_s12 = int_to_ptr.vmem [resolvable:$true] %s54_s12 }
  0x36   :  { %p568_p11 = scmp.lt.u32.totalorder %s564_s16, %s767_s3 }
  0x38   :  { %p570_p12 = pnand %p568_p11, %p565_p10 }
  0x3a   :  { %573 = shalt.err (!%p570_p12)
}
  0x3b   :  { %s574_s21 = scalar_lea.vmem %s55_s12, 512  ;;  %p579_p0 = scmp.lt.s32.totalorder %s55_s12, %s55_s12 }
  0x3c   :  { %p575_p13 = scmp.ne.s32.totalorder %s55_s12, %s574_s21  ;;  %p580_p1 = scmp.lt.s32.totalorder %s574_s21, %s574_s21 }
  0x3e   :  { %p581_p2 = por %p580_p1, %p579_p0 }
  0x40   :  { %p582_p3 = pnand %p581_p2, %p575_p13 }
  0x42   :  { %585 = shalt.err (!%p582_p3)
}
  0x43   :  { %60 = dma.hbm_to_vmem [thread:$0]  %s767_s3, 512, %s55_s12, [#allocation9], %s617_s7, %s617_s7, %s618_s8  }
  0x44   :  { %608 = dma.done.wait [#allocation3], 32  }
  0x45   :  { %609 = vsyncadd [#allocation3], 4294967264 }
  0x46   :  { %610 = dma.done.wait [#allocation6], 768  }
  0x47   :  { %611 = vsyncadd [#allocation6], 4294966528 }
  0x48   :  { %612 = dma.done.wait [#allocation9], 512  }
  0x49   :  { %613 = vsyncadd [#allocation9], 4294966784  ;;  %v622_v0 = vmov 0.0|0.0   ;;  %vm623_vm0 = vmmov 0   ;;  %v624_v1 = vmov 0.0   ;;  %v78_v2 = vld [vmem:[#allocation7] sm:$0xff]  ;;  %v254_v19 = vlaneseq }
  0x4a   :  { %460 = vmatprep.subr.bf16.mxu0 %v622_v0  ;;  %446 = vmatprep.mubr.msk.f32.mxu0 %vm623_vm0, %v624_v1  ;;  %v79_v3 = vld [vmem:[#allocation7 + $0x8] sm:$0xff]  ;;  %v80_v4 = vld [vmem:[#allocation7 + $0x10] sm:$0xff]  ;;  %v81_v6 = vld [vmem:[#allocation7 + $0x18] sm:$0xff]  ;;  %vm89_vm1 = vcmask 261120   ;;  %v625_v17 = vmov 1966171168  }
  0x4b   :  { %v461_v5 = vpack.c.bf16 %v79_v3, %v78_v2  ;;  %v165_v7 = vld [vmem:[#allocation8] sm:$0xff]  ;;  %v166_v8 = vld [vmem:[#allocation8 + $0x8] sm:$0xff]  ;;  %v167_v10 = vld [vmem:[#allocation8 + $0x10] sm:$0xff]  ;;  %v464_v12 = vpack.c.bf16 %v81_v6, %v80_v4  ;;  %v252_v18 = vunpack.c.l.s4 %v625_v17  ;;  %v729_v21 = vshrl.u32 %v254_v19, 7 }
  0x4c   :  { %v466_v9 = vpack.c.bf16 %v166_v8, %v165_v7  ;;  %v168_v11 = vld [vmem:[#allocation8 + $0x18] sm:$0xff]  ;;  %v720_v14 = vld [vmem:[#allocation5] sm:$0xff]  ;;  %v77_v15 = vld [vmem:[#allocation2] sm:$0x3]  ;;  %v305_v45 = vand.u32 127, %v254_v19  ;;  %vm314_vm2 = vcmask 1041409  }
  0x4d   :  { %462 = vmatpush3.bf16.msra.mxu0 %v461_v5  ;;  %v470_v13 = vpack.c.bf16 %v168_v11, %v167_v10  ;;  %457 = vmatprep.mubr.msk.f32.mxu1 %vm89_vm1, %v720_v14  ;;  %v724_v16 = vld [vmem:[#allocation5 + $0x8] sm:$0xff]  ;;  %v253_v20 = vunpack.c.0.s8 %v252_v18  ;;  %v422_v22 = vld [vmem:[%s768_s4] ss:$0 sm:$0xff]  ;;  %v275_v29 = vsub.s32 0, %v729_v21  ;;  %vm317_vm3 = vcmask 58368  }
  0x4e   :  { %463 = vmatprep.subr.bf16.mxu0 %v622_v0  ;;  %467 = vmatprep.subr.bf16.mxu1 %v466_v9  ;;  %v426_v38 = vld [vmem:[%s769_s5] ss:$0 sm:$0xff]  ;;  %v308_v47 = vsub.s32 %v305_v45, %v729_v21  ;;  %v626_v53 = vmov 0   ;;  %v328_v54 = vsub.s32 1, %v729_v21  ;;  %s627_s5 = smov [#allocation10]   ;;  %vm403_vm4 = vcmask 254976  }
  0x4f   :  { %469 = vmatpush3.bf16.msra.mxu1 %v466_v9  ;;  %v256_v23 = vsub.s32 %v253_v20, %v729_v21  ;;  %487 = vset.pattern.permute.xlu0 %v626_v53  ;;  %s411_s1 = sshll.u32 %s627_s5, 4  ;;  %s412_s1 = int_to_ptr.vmem [resolvable:$true] %s411_s1 }
  0x50   :  { %471 = vmatprep.subr.bf16.mxu1 %v470_v13  ;;  %486 = vset.pattern.permute.xlu1 %v626_v53  ;;  %s586_s22 = scalar_lea.vmem %s412_s1, 32  ;;  %p591_p5 = scmp.lt.s32.totalorder %s412_s1, %s412_s1 }
  0x51   :  { %465 = vmatpush3.bf16.msra.mxu0 %v464_v12  ;;  %p587_p4 = scmp.ne.s32.totalorder %s412_s1, %s586_s22  ;;  %p592_p6 = scmp.lt.s32.totalorder %s586_s22, %s586_s22 }
  0x53   :  { %473 = vmatpush3.bf16.msra.mxu1 %v470_v13  ;;  %p593_p7 = por %p592_p6, %p591_p5 }
  0x54   :  { %447 = vmatmul.mubr.msk.f32.vlgmr.msra.gmra.mrb[0].mxu0 %vm89_vm1, %v77_v15 }
  0x55   :  { %p594_p8 = pnand %p593_p7, %p587_p4 }
  0x56   :  { %458 = vmatmul.mubr.msk.f32.vlgmr.msra.gmra.mrb[0].mxu1 %vm89_vm1, %v724_v16 }
 0x127   :  { %v159_v24 = vpop.f32.mrb[0].mxu0 }
 0x128   :  { %v160_v25 = vadd.f32 %v422_v22, %v159_v24  ;;  %v448_v26 = vpop.f32.mrb[1].mxu0 }
 0x129   :  { %v459_v27 = vpop.f32.mrb[0].mxu1 }
 0x12a   :  { %v257_v28 = vrot.slane %v160_v25, %v256_v23  ;;  %v241_v30 = vpop.f32.mrb[1].mxu1 }
 0x12c   :  { %v258_v31 = vcombine.high %v257_v28, %v257_v28  ;;  %v265_v32 = vrot.slane %v257_v28, %v256_v23 }
 0x12e   :  { %v272_v33 = vrot.slane %v258_v31, %v256_v23  ;;  %v276_v34 = vrot.slane %v265_v32, %v275_v29 }
 0x130   :  { %v280_v35 = vrot.slane %v272_v33, %v275_v29  ;;  %v283_v36 = vadd.f32 %v276_v34, %v241_v30 }
 0x132   :  { %v284_v37 = vadd.f32 %v459_v27, %v280_v35  ;;  %488 = vtanh.f32 %v283_v36 }
 0x134   :  { %490 = vtanh.f32 %v284_v37 }
 0x13c   :  { %v489_v39 = vpop.eup %488 }
 0x13d   :  { %v294_v40 = vmul.f32 %v489_v39, %v426_v38 }
 0x13e   :  { %v491_v41 = vpop.eup %490 }
 0x13f   :  { %v296_v42 = vsel %vm89_vm1, %v294_v40, 0.0  ;;  %v295_v43 = vmul.f32 %v491_v41, %v426_v38 }
 0x140   :  { %297 = vadd.xlane.f32.xlu0 %v296_v42 }
 0x141   :  { %v299_v44 = vsel %vm89_vm1, %v295_v43, 0.0 }
 0x144   :  { %300 = vadd.xlane.f32.xlu0 %v299_v44 }
 0x1cd   :  { %v298_v46 = vpop.xlane.xlu0 %297 }
 0x1ce   :  { %v309_v49 = vrot.slane %v298_v46, %v308_v47 }
 0x1d1   :  { %v301_v48 = vpop.xlane.xlu0 %300 }
 0x1d2   :  { %v313_v50 = vrot.slane %v301_v48, %v308_v47 }
 0x1d4   :  { %v315_v51 = vsel %vm314_vm2, %v313_v50, %v309_v49 }
 0x1d5   :  { %v318_v52 = vsel %vm317_vm3, %v315_v51, -inf }
 0x1d6   :  { %319 = vmax.xlane.f32.xlu1 %v318_v52 }
 0x263   :  { %v320_v55 = vpop.xlane.xlu1 %319 }
 0x264   :  { %v325_v56 = vrot.slane %v320_v55, %v275_v29  ;;  %v329_v57 = vrot.slane %v320_v55, %v328_v54 }
 0x266   :  { %v332_v58 = vsub.f32 %v298_v46, %v325_v56  ;;  %v333_v59 = vsub.f32 %v301_v48, %v329_v57 }
 0x268   :  { %v334_v60 = vmul.f32 1.442695, %v332_v58  ;;  %v336_v61 = vmul.f32 1.442695, %v333_v59 }
 0x26a   :  { %492 = vpow2.f32 %v334_v60 }
 0x26b   :  { %494 = vpow2.f32 %v336_v61 }
 0x274   :  { %v493_v62 = vpop.eup %492 }
 0x275   :  { %v495_v63 = vpop.eup %494  ;;  %341 = vperm.xlu1 %486, %v493_v62  }
 0x276   :  { %344 = vperm.xlu0 %487, %v495_v63  }
 0x2f4   :  { %v342_v0 = vpop.permute.xlu1 %341 }
 0x2f5   :  { %v345_v1 = vpop.permute.xlu0 %344  ;;  %v349_v2 = vrot.slane %v342_v0, %v308_v47 }
 0x2f6   :  { %v353_v3 = vrot.slane %v345_v1, %v308_v47 }
 0x2f8   :  { %v354_v4 = vsel %vm314_vm2, %v353_v3, %v349_v2 }
 0x2f9   :  { %v356_v5 = vsel %vm317_vm3, %v354_v4, 0.0 }
 0x2fa   :  { %357 = vadd.xlane.f32.xlu1 %v356_v5 }
 0x387   :  { %v358_v6 = vpop.xlane.xlu1 %357 }
 0x388   :  { %496 = vrcp.f32 %v358_v6 }
 0x392   :  { %v497_v7 = vpop.eup %496 }
 0x393   :  { %v364_v8 = vrot.slane %v497_v7, %v275_v29  ;;  %v368_v10 = vrot.slane %v497_v7, %v328_v54 }
 0x395   :  { %v371_v9 = vmul.f32 %v493_v62, %v364_v8  ;;  %v372_v11 = vmul.f32 %v495_v63, %v368_v10 }
 0x397   :  { %375 = vperm.xlu0 %487, %v371_v9  }
 0x39b   :  { %380 = vperm.xlu0 %487, %v372_v11  }
 0x416   :  { %v376_v12 = vpop.permute.xlu0 %375 }
 0x417   :  { %v383_v13 = vmul.f32 %v376_v12, %v720_v14 }
 0x419   :  { %v385_v15 = vsel %vm89_vm1, %v383_v13, 0.0 }
 0x41a   :  { %v386_v17 = vrot.slane %v385_v15, 4  ;;  %v381_v18 = vpop.permute.xlu0 %380 }
 0x41b   :  { %v384_v19 = vmul.f32 %v381_v18, %v724_v16 }
 0x41c   :  { %v387_v20 = vadd.f32 %v386_v17, %v385_v15 }
 0x41d   :  { %v392_v21 = vsel %vm89_vm1, %v384_v19, 0.0 }
 0x41e   :  { %v388_v22 = vrot.slane %v387_v20, 2  ;;  %v393_v23 = vrot.slane %v392_v21, 4 }
 0x420   :  { %v389_v24 = vadd.f32 %v388_v22, %v387_v20  ;;  %v394_v25 = vadd.f32 %v393_v23, %v392_v21 }
 0x422   :  { %v395_v26 = vrot.slane %v394_v25, 2  ;;  %v390_v27 = vrot.slane %v389_v24, 1 }
 0x424   :  { %v396_v28 = vadd.f32 %v395_v26, %v394_v25  ;;  %v391_v14 = vadd.f32 %v390_v27, %v389_v24 }
 0x426   :  { %v397_v29 = vrot.slane %v396_v28, 1 }
 0x428   :  { %v398_v30 = vadd.f32 %v397_v29, %v396_v28 }
 0x42a   :  { %v401_v31 = vsel %vm314_vm2, %v398_v30, %v391_v14 }
 0x42b   :  { %404 = vst.msk [vmem:[#allocation10] sm:$0x3] %vm403_vm4, %v401_v31 }
 0x42c   :  { %597 = shalt.err (!%p594_p8)
}
 0x42d   :  { %s598_s25 = scalar_lea.hbm %s770_s6, 32 }
 0x42e   :  { %p599_p9 = scmp.ne.s32.totalorder %s770_s6, %s598_s25  ;;  %p602_p10 = scmp.lt.u32.totalorder %s598_s25, %s770_s6 }
 0x430   :  { %p604_p11 = pnand %p602_p10, %p599_p9 }
 0x432   :  { %607 = shalt.err (!%p604_p11)
}
 0x433   :  { %414 = dma.vmem_to_hbm [thread:$0]  %s412_s1, 32, %s770_s6, [#allocation4]  }
 0x434   :  { %614 = dma.done.wait [#allocation4], 32  }
 0x435   :  { %615 = vsyncadd [#allocation4], 4294967264 }
 0x436   :  { %418 = vsyncpa [#allocation3], 1 }
 0x437   :  { %419 = vsyncpa [#allocation6], 1 }
 0x438   :  { %420 = vsyncpa [#allocation9], 1 }
 0x439   :  { %421 = vsyncpa [#allocation4], 1 }

</bundles_post_ra>
